<compile_context>
chip_gen: v6e
topology: v6e:2x2x1
jax: 0.10.0
libtpu: 0.0.40
codegen_flags: <defaults>
</compile_context>

<pallas_src>
import functools
import math

import jax
import jax.numpy as jnp
from jax import lax
from jax.experimental import pallas as pl
from jax.experimental.pallas import tpu as pltpu


def _round_up(x, m):
    return ((x + m - 1) // m) * m


# ----------------------------------------------------------------------------
# Pallas kernel: one (batch-tile, time-chunk) grid step of the recurrence.
#   seq_ref   : (Tc, Nb, Dp)   raw padded input chunk (streamed, double-buffered)
#   h0_ref    : (Nb, Hp)       initial hidden state (resident)
#   wih_ref   : (Dp, Hp)       W_ih^T (padded, resident)
#   whh_ref   : (Hp, Hp)       W_hh^T (padded, resident)
#   b_ref     : (1, Hp)        b_ih + b_hh (padded, resident)
#   hfinal_ref: (Nb, Hp)       final hidden state (lane-dense output, resident)
#   h_scratch : (Nb, Hp)       hidden-state carry across time chunks
# ----------------------------------------------------------------------------
def _rnn_recurrence_kernel(seq_ref, h0_ref, wih_ref, whh_ref, b_ref,
                           hfinal_ref, h_scratch, *,
                           nonlinearity, chunk_size, seq_len, needs_mask):
    t_chunk = pl.program_id(1)

    @pl.when(t_chunk == 0)
    def _():
        h_scratch[...] = h0_ref[...]

    base_t = t_chunk * chunk_size

    def step(i, h):
        x = seq_ref[i]                                              # (Nb, Dp)
        pre = (jnp.dot(x, wih_ref[...], preferred_element_type=jnp.float32)
               + b_ref[...]
               + jnp.dot(h, whh_ref[...], preferred_element_type=jnp.float32))
        if nonlinearity == "tanh":
            h_new = jnp.tanh(pre)
        else:
            h_new = jnp.maximum(pre, 0.0)
        if needs_mask:  # only when L is not a multiple of the chunk size
            h_new = jnp.where(base_t + i < seq_len, h_new, h)
        return h_new

    # Tc is small and static: unroll the inner chunk so LLO sees the whole chain.
    h = lax.fori_loop(0, chunk_size, step, h_scratch[...], unroll=True)
    h_scratch[...] = h

    @pl.when(t_chunk == pl.num_programs(1) - 1)
    def _():
        hfinal_ref[...] = h


# ----------------------------------------------------------------------------
# jit-compiled forward implementation (pad -> pallas_call -> final Linear)
# ----------------------------------------------------------------------------
@functools.partial(jax.jit, static_argnames=("nonlinearity", "hidden_size"))
def _rnn_forward_impl(sequence, h0_2d, w_ih_p, w_hh_p, b_comb_p, w_lin_T, b_lin,
                      *, nonlinearity, hidden_size):
    L, N, D = sequence.shape
    H = hidden_size
    Dp, Hp = w_ih_p.shape

    # ---- Time chunking + batch tiling (all static, derived from shapes). ----
    Tc = max(1, min(32, L))
    num_chunks = -(-L // Tc)
    L_pad = num_chunks * Tc
    needs_mask = (L_pad != L)

    Np = _round_up(max(N, 1), 8)
    Nb = Np if Np <= 64 else 64            # batch tile (split big batches -> v7x cores)
    Np = _round_up(Np, Nb)
    num_btiles = Np // Nb

    # ---- Pad only the small per-call tensors (weights already padded). ----
    seq_p = jnp.zeros((L_pad, Np, Dp), jnp.float32).at[:L, :N, :D].set(sequence)
    h0_p = jnp.zeros((Np, Hp), jnp.float32).at[:N, :H].set(h0_2d)

    kernel = functools.partial(_rnn_recurrence_kernel,
                               nonlinearity=nonlinearity, chunk_size=Tc,
                               seq_len=L, needs_mask=needs_mask)

    # Explicit VMEM cap: 2 sequence chunks + double-buffered residents + scratch.
    vmem_bytes = 4 * (2 * Tc * Nb * Dp + 2 * Nb * Hp + 2 * Dp * Hp
                      + 2 * Hp * Hp + 2 * Hp + 2 * Nb * Hp + Nb * Hp)
    vmem_limit = int(min(max(2 * vmem_bytes, 4 * 1024 * 1024), 100 * 1024 * 1024))

    hfin_p = pl.pallas_call(
        kernel,
        out_shape=jax.ShapeDtypeStruct((Np, Hp), jnp.float32),
        grid_spec=pltpu.PrefetchScalarGridSpec(
            num_scalar_prefetch=0,
            grid=(num_btiles, num_chunks),
            in_specs=[
                pl.BlockSpec((Tc, Nb, Dp), lambda b, t: (t, b, 0)),   # sequence chunk
                pl.BlockSpec((Nb, Hp), lambda b, t: (b, 0)),          # h_0
                pl.BlockSpec((Dp, Hp), lambda b, t: (0, 0)),          # W_ih^T
                pl.BlockSpec((Hp, Hp), lambda b, t: (0, 0)),          # W_hh^T
                pl.BlockSpec((1, Hp), lambda b, t: (0, 0)),           # b_ih + b_hh
            ],
            out_specs=pl.BlockSpec((Nb, Hp), lambda b, t: (b, 0)),    # final h
            scratch_shapes=[pltpu.VMEM((Nb, Hp), jnp.float32)],       # hidden carry
        ),
        compiler_params=pltpu.CompilerParams(
            dimension_semantics=("parallel", "arbitrary"),
            vmem_limit_bytes=vmem_limit,
        ),
    )(seq_p, h0_p, w_ih_p, w_hh_p, b_comb_p)

    # ---- Slice padding off; final Linear (H -> 1) fused here by XLA. ----
    h_final2d = hfin_p[:N, :H]                       # (N, H)
    out2d = h_final2d @ w_lin_T + b_lin              # (N, 1)
    return out2d, h_final2d


# ----------------------------------------------------------------------------
# Wrapper: parameter container + forward()
# ----------------------------------------------------------------------------
class RNNPallas:
    def __init__(self, input_size, hidden_size, num_layers, nonlinearity,
                 foretime=3, backtime=20, key=None):
        assert num_layers == 1, "Pallas implementation supports num_layers == 1"
        assert nonlinearity in ("tanh", "relu")
        self.input_size = input_size + 5
        self.hidden_size = hidden_size
        self.num_layers = num_layers
        self.nonlinearity = nonlinearity
        self.foretime = foretime
        self.backtime = backtime

        if key is None:
            key = jax.random.PRNGKey(0)
        ks = jax.random.split(key, 8)
        H, D = self.hidden_size, self.input_size
        bound = 1.0 / math.sqrt(float(H))

        def u(k, shape):
            return jax.random.uniform(k, shape, jnp.float32, -bound, bound)

        # nn.RNN parameters (stored transposed: x @ W^T == x @ W_T)
        self.w_ih_T = u(ks[0], (D, H))      # == W_ih^T, W_ih: (H, D)
        self.w_hh_T = u(ks[1], (H, H))      # == W_hh^T
        self.b_ih = u(ks[2], (H,))
        self.b_hh = u(ks[3], (H,))
        # nn.Linear(hidden_size, 1)
        self.w_lin_T = u(ks[4], (H, 1))     # == W_lin^T, W_lin: (1, H)
        self.b_lin = u(ks[5], (1,))
        # get_h0: nn.Linear(5, num_layers * hidden_size)
        self.w_h0_T = u(ks[6], (5, self.num_layers * H))
        self.b_h0 = u(ks[7], (self.num_layers * H,))

        # ---- Kernel-ready padded parameters, built once (not per call). ----
        # Padded rows/cols are zero, so the padded hidden lanes stay exactly zero
        # through the recurrence (tanh(0)=relu(0)=0) and are sliced off.
        self.Dp = _round_up(D, 8)
        self.Hp = _round_up(H, 128)
        self.w_ih_p = jnp.zeros((self.Dp, self.Hp), jnp.float32).at[:D, :H].set(self.w_ih_T)
        self.w_hh_p = jnp.zeros((self.Hp, self.Hp), jnp.float32).at[:H, :H].set(self.w_hh_T)
        self.b_comb_p = jnp.zeros((1, self.Hp), jnp.float32).at[0, :H].set(self.b_ih + self.b_hh)

    def get_h0(self, pp0):
        """pp0: (N, 5) -> (num_layers, N, hidden_size)  (plain JAX glue)."""
        h = pp0 @ self.w_h0_T + self.b_h0
        return h.reshape(self.num_layers, pp0.shape[0], self.hidden_size)

    def forward(self, sequence, h_0=None, full=False):
        """sequence: (L, N, input_size + 5) float32."""
        L, N, D = sequence.shape
        H = self.hidden_size
        assert D == self.input_size

        if h_0 is None:
            h_0 = jnp.zeros((self.num_layers, N, H), jnp.float32)

        out2d, h_final2d = _rnn_forward_impl(
            sequence, h_0[0], self.w_ih_p, self.w_hh_p, self.b_comb_p,
            self.w_lin_T, self.b_lin,
            nonlinearity=self.nonlinearity, hidden_size=H)

        output = out2d.reshape(1, N, 1)
        if full:
            return output, h_final2d.reshape(self.num_layers, N, H)
        return output


# ----------------------------------------------------------------------------
# Pure-JAX reference (for correctness check)
# ----------------------------------------------------------------------------
def _reference_forward(model, sequence, h_0=None):
    L, N, D = sequence.shape
    H = model.hidden_size
    h = jnp.zeros((N, H), jnp.float32) if h_0 is None else h_0[0]
    act = jnp.tanh if model.nonlinearity == "tanh" else lambda v: jnp.maximum(v, 0.0)
    for t in range(L):
        h = act(sequence[t] @ model.w_ih_T + model.b_ih + h @ model.w_hh_T + model.b_hh)
    out = h @ model.w_lin_T + model.b_lin
    return out.reshape(1, N, 1), h.reshape(model.num_layers, N, H)


if __name__ == "__main__":
    key = jax.random.PRNGKey(0)
    k_seq, k_pp, k_param = jax.random.split(key, 3)

    L, N = 8, 2
    input_size, hidden_size, num_layers = 1, 32, 1

    model = RNNPallas(input_size, hidden_size, num_layers, "tanh",
                      foretime=3, backtime=20, key=k_param)

    # sequence (L, N, 1) + pandemic parameters (L, N, 5) -> (L, N, 6)
    ts = jax.random.normal(k_seq, (L, N, input_size), jnp.float32)
    pp = jax.random.normal(k_pp, (L, N, 5), jnp.float32)
    pp_sequence = jnp.concatenate([ts, pp], axis=2)

    # h_0 from the get_h0 linear head (as in predict()), computed in plain JAX glue
    h_0 = model.get_h0(pp[0])

    out, h_final = model.forward(pp_sequence, h_0=h_0, full=True)
    out = jax.block_until_ready(out)
    h_final = jax.block_until_ready(h_final)

    ref_out, ref_h = _reference_forward(model, pp_sequence, h_0)
    assert out.shape == (1, N, 1) and h_final.shape == (num_layers, N, hidden_size)
    assert jnp.allclose(out, ref_out, atol=1e-5, rtol=1e-5)
    assert jnp.allclose(h_final, ref_h, atol=1e-5, rtol=1e-5)

    print("KERNEL_OK")
</pallas_src>

<mosaic_0001>
module attributes {stable_mosaic.version = 11 : i64} {
  func.func @_rnn_recurrence_kernel(%arg0: i32, %arg1: i32, %arg2: memref<8x8x8xf32, #tpu.memory_space<vmem>>, %arg3: memref<8x128xf32, #tpu.memory_space<vmem>>, %arg4: memref<8x128xf32, #tpu.memory_space<vmem>>, %arg5: memref<128x128xf32, #tpu.memory_space<vmem>>, %arg6: memref<1x128xf32, #tpu.memory_space<vmem>>, %arg7: memref<8x128xf32, #tpu.memory_space<vmem>>, %arg8: memref<8x128xf32, #tpu.memory_space<vmem>>) attributes {dimension_semantics = [#tpu.dimension_semantics<parallel>, #tpu.dimension_semantics<arbitrary>], iteration_bounds = array<i64: 1, 1>, scalar_prefetch = 0 : i64, scratch_operands = 1 : i64, tpu.core_type = #tpu.core_type<tc>, window_params = [{transform_indices = @transform_0, window_bounds = array<i64: 8, 8, 8>}, {transform_indices = @transform_1, window_bounds = array<i64: 8, 128>}, {pipeline_mode = #tpu.pipeline_mode<synchronous>, transform_indices = @transform_2, window_bounds = array<i64: 8, 128>}, {pipeline_mode = #tpu.pipeline_mode<synchronous>, transform_indices = @transform_3, window_bounds = array<i64: 128, 128>}, {pipeline_mode = #tpu.pipeline_mode<synchronous>, transform_indices = @transform_4, window_bounds = array<i64: 1, 128>}, {transform_indices = @transform_5, window_bounds = array<i64: 8, 128>}]} {
    %c0_i32 = arith.constant 0 : i32
    %0 = arith.cmpi eq, %arg1, %c0_i32 : i32
    %1 = arith.extui %0 : i1 to i32
    %c0_i32_0 = arith.constant 0 : i32
    %2 = arith.cmpi ne, %1, %c0_i32_0 : i32
    scf.if %2 {
      %c0_86 = arith.constant 0 : index
      %c0_87 = arith.constant 0 : index
      %104 = vector.load %arg3[%c0_86, %c0_87] : memref<8x128xf32, #tpu.memory_space<vmem>>, vector<8x128xf32>
      %c0_88 = arith.constant 0 : index
      %c0_89 = arith.constant 0 : index
      %105 = vector.load %arg8[%c0_88, %c0_89] : memref<8x128xf32, #tpu.memory_space<vmem>>, vector<8x128xf32>
      tpu.vector_store %arg8[%c0_88, %c0_89], %104 {strides = array<i32>} : memref<8x128xf32, #tpu.memory_space<vmem>>, vector<8x128xf32>,
    } else {
    }
    %c0 = arith.constant 0 : index
    %c0_1 = arith.constant 0 : index
    %3 = vector.load %arg8[%c0, %c0_1] : memref<8x128xf32, #tpu.memory_space<vmem>>, vector<8x128xf32>
    %c0_i32_2 = arith.constant 0 : i32
    %4 = arith.index_cast %c0_i32_2 : i32 to index
    %c0_3 = arith.constant 0 : index
    %c0_4 = arith.constant 0 : index
    %5 = vector.load %arg2[%4, %c0_3, %c0_4] : memref<8x8x8xf32, #tpu.memory_space<vmem>>, vector<1x8x8xf32>
    %6 = vector.shape_cast %5 : vector<1x8x8xf32> to vector<8x8xf32>
    %c0_5 = arith.constant 0 : index
    %c0_6 = arith.constant 0 : index
    %7 = vector.load %arg4[%c0_5, %c0_6] : memref<8x128xf32, #tpu.memory_space<vmem>>, vector<8x128xf32>
    %cst = arith.constant dense<0.000000e+00> : vector<8x128xf32>
    %8 = tpu.matmul %6, %7, %cst {dimension_numbers = #tpu.dot_dimension_numbers<[1], [0], [0], [1], [0, 0, 1, 1], [], []>} : vector<8x8xf32>, vector<8x128xf32>, vector<8x128xf32> -> vector<8x128xf32>
    %c0_7 = arith.constant 0 : index
    %c0_8 = arith.constant 0 : index
    %9 = vector.load %arg6[%c0_7, %c0_8] : memref<1x128xf32, #tpu.memory_space<vmem>>, vector<1x128xf32>
    %10 = vector.broadcast %9 : vector<1x128xf32> to vector<8x128xf32>
    %11 = arith.addf %8, %10 : vector<8x128xf32>
    %c0_9 = arith.constant 0 : index
    %c0_10 = arith.constant 0 : index
    %12 = vector.load %arg5[%c0_9, %c0_10] : memref<128x128xf32, #tpu.memory_space<vmem>>, vector<128x128xf32>
    %cst_11 = arith.constant dense<0.000000e+00> : vector<8x128xf32>
    %13 = tpu.matmul %3, %12, %cst_11 {dimension_numbers = #tpu.dot_dimension_numbers<[1], [0], [0], [1], [0, 0, 1, 1], [], []>} : vector<8x128xf32>, vector<128x128xf32>, vector<8x128xf32> -> vector<8x128xf32>
    %14 = arith.addf %11, %13 : vector<8x128xf32>
    %15 = math.tanh %14 : vector<8x128xf32>
    %c1_i32 = arith.constant 1 : i32
    %16 = arith.index_cast %c1_i32 : i32 to index
    %c0_12 = arith.constant 0 : index
    %c0_13 = arith.constant 0 : index
    %17 = vector.load %arg2[%16, %c0_12, %c0_13] : memref<8x8x8xf32, #tpu.memory_space<vmem>>, vector<1x8x8xf32>
    %18 = vector.shape_cast %17 : vector<1x8x8xf32> to vector<8x8xf32>
    %c0_14 = arith.constant 0 : index
    %c0_15 = arith.constant 0 : index
    %19 = vector.load %arg4[%c0_14, %c0_15] : memref<8x128xf32, #tpu.memory_space<vmem>>, vector<8x128xf32>
    %cst_16 = arith.constant dense<0.000000e+00> : vector<8x128xf32>
    %20 = tpu.matmul %18, %19, %cst_16 {dimension_numbers = #tpu.dot_dimension_numbers<[1], [0], [0], [1], [0, 0, 1, 1], [], []>} : vector<8x8xf32>, vector<8x128xf32>, vector<8x128xf32> -> vector<8x128xf32>
    %c0_17 = arith.constant 0 : index
    %c0_18 = arith.constant 0 : index
    %21 = vector.load %arg6[%c0_17, %c0_18] : memref<1x128xf32, #tpu.memory_space<vmem>>, vector<1x128xf32>
    %22 = vector.broadcast %21 : vector<1x128xf32> to vector<8x128xf32>
    %23 = arith.addf %20, %22 : vector<8x128xf32>
    %c0_19 = arith.constant 0 : index
    %c0_20 = arith.constant 0 : index
    %24 = vector.load %arg5[%c0_19, %c0_20] : memref<128x128xf32, #tpu.memory_space<vmem>>, vector<128x128xf32>
    %cst_21 = arith.constant dense<0.000000e+00> : vector<8x128xf32>
    %25 = tpu.matmul %15, %24, %cst_21 {dimension_numbers = #tpu.dot_dimension_numbers<[1], [0], [0], [1], [0, 0, 1, 1], [], []>} : vector<8x128xf32>, vector<128x128xf32>, vector<8x128xf32> -> vector<8x128xf32>
    %26 = arith.addf %23, %25 : vector<8x128xf32>
    %27 = math.tanh %26 : vector<8x128xf32>
    %c2_i32 = arith.constant 2 : i32
    %28 = arith.index_cast %c2_i32 : i32 to index
    %c0_22 = arith.constant 0 : index
    %c0_23 = arith.constant 0 : index
    %29 = vector.load %arg2[%28, %c0_22, %c0_23] : memref<8x8x8xf32, #tpu.memory_space<vmem>>, vector<1x8x8xf32>
    %30 = vector.shape_cast %29 : vector<1x8x8xf32> to vector<8x8xf32>
    %c0_24 = arith.constant 0 : index
    %c0_25 = arith.constant 0 : index
    %31 = vector.load %arg4[%c0_24, %c0_25] : memref<8x128xf32, #tpu.memory_space<vmem>>, vector<8x128xf32>
    %cst_26 = arith.constant dense<0.000000e+00> : vector<8x128xf32>
    %32 = tpu.matmul %30, %31, %cst_26 {dimension_numbers = #tpu.dot_dimension_numbers<[1], [0], [0], [1], [0, 0, 1, 1], [], []>} : vector<8x8xf32>, vector<8x128xf32>, vector<8x128xf32> -> vector<8x128xf32>
    %c0_27 = arith.constant 0 : index
    %c0_28 = arith.constant 0 : index
    %33 = vector.load %arg6[%c0_27, %c0_28] : memref<1x128xf32, #tpu.memory_space<vmem>>, vector<1x128xf32>
    %34 = vector.broadcast %33 : vector<1x128xf32> to vector<8x128xf32>
    %35 = arith.addf %32, %34 : vector<8x128xf32>
    %c0_29 = arith.constant 0 : index
    %c0_30 = arith.constant 0 : index
    %36 = vector.load %arg5[%c0_29, %c0_30] : memref<128x128xf32, #tpu.memory_space<vmem>>, vector<128x128xf32>
    %cst_31 = arith.constant dense<0.000000e+00> : vector<8x128xf32>
    %37 = tpu.matmul %27, %36, %cst_31 {dimension_numbers = #tpu.dot_dimension_numbers<[1], [0], [0], [1], [0, 0, 1, 1], [], []>} : vector<8x128xf32>, vector<128x128xf32>, vector<8x128xf32> -> vector<8x128xf32>
    %38 = arith.addf %35, %37 : vector<8x128xf32>
    %39 = math.tanh %38 : vector<8x128xf32>
    %c3_i32 = arith.constant 3 : i32
    %40 = arith.index_cast %c3_i32 : i32 to index
    %c0_32 = arith.constant 0 : index
    %c0_33 = arith.constant 0 : index
    %41 = vector.load %arg2[%40, %c0_32, %c0_33] : memref<8x8x8xf32, #tpu.memory_space<vmem>>, vector<1x8x8xf32>
    %42 = vector.shape_cast %41 : vector<1x8x8xf32> to vector<8x8xf32>
    %c0_34 = arith.constant 0 : index
    %c0_35 = arith.constant 0 : index
    %43 = vector.load %arg4[%c0_34, %c0_35] : memref<8x128xf32, #tpu.memory_space<vmem>>, vector<8x128xf32>
    %cst_36 = arith.constant dense<0.000000e+00> : vector<8x128xf32>
    %44 = tpu.matmul %42, %43, %cst_36 {dimension_numbers = #tpu.dot_dimension_numbers<[1], [0], [0], [1], [0, 0, 1, 1], [], []>} : vector<8x8xf32>, vector<8x128xf32>, vector<8x128xf32> -> vector<8x128xf32>
    %c0_37 = arith.constant 0 : index
    %c0_38 = arith.constant 0 : index
    %45 = vector.load %arg6[%c0_37, %c0_38] : memref<1x128xf32, #tpu.memory_space<vmem>>, vector<1x128xf32>
    %46 = vector.broadcast %45 : vector<1x128xf32> to vector<8x128xf32>
    %47 = arith.addf %44, %46 : vector<8x128xf32>
    %c0_39 = arith.constant 0 : index
    %c0_40 = arith.constant 0 : index
    %48 = vector.load %arg5[%c0_39, %c0_40] : memref<128x128xf32, #tpu.memory_space<vmem>>, vector<128x128xf32>
    %cst_41 = arith.constant dense<0.000000e+00> : vector<8x128xf32>
    %49 = tpu.matmul %39, %48, %cst_41 {dimension_numbers = #tpu.dot_dimension_numbers<[1], [0], [0], [1], [0, 0, 1, 1], [], []>} : vector<8x128xf32>, vector<128x128xf32>, vector<8x128xf32> -> vector<8x128xf32>
    %50 = arith.addf %47, %49 : vector<8x128xf32>
    %51 = math.tanh %50 : vector<8x128xf32>
    %c4_i32 = arith.constant 4 : i32
    %52 = arith.index_cast %c4_i32 : i32 to index
    %c0_42 = arith.constant 0 : index
    %c0_43 = arith.constant 0 : index
    %53 = vector.load %arg2[%52, %c0_42, %c0_43] : memref<8x8x8xf32, #tpu.memory_space<vmem>>, vector<1x8x8xf32>
    %54 = vector.shape_cast %53 : vector<1x8x8xf32> to vector<8x8xf32>
    %c0_44 = arith.constant 0 : index
    %c0_45 = arith.constant 0 : index
    %55 = vector.load %arg4[%c0_44, %c0_45] : memref<8x128xf32, #tpu.memory_space<vmem>>, vector<8x128xf32>
    %cst_46 = arith.constant dense<0.000000e+00> : vector<8x128xf32>
    %56 = tpu.matmul %54, %55, %cst_46 {dimension_numbers = #tpu.dot_dimension_numbers<[1], [0], [0], [1], [0, 0, 1, 1], [], []>} : vector<8x8xf32>, vector<8x128xf32>, vector<8x128xf32> -> vector<8x128xf32>
    %c0_47 = arith.constant 0 : index
    %c0_48 = arith.constant 0 : index
    %57 = vector.load %arg6[%c0_47, %c0_48] : memref<1x128xf32, #tpu.memory_space<vmem>>, vector<1x128xf32>
    %58 = vector.broadcast %57 : vector<1x128xf32> to vector<8x128xf32>
    %59 = arith.addf %56, %58 : vector<8x128xf32>
    %c0_49 = arith.constant 0 : index
    %c0_50 = arith.constant 0 : index
    %60 = vector.load %arg5[%c0_49, %c0_50] : memref<128x128xf32, #tpu.memory_space<vmem>>, vector<128x128xf32>
    %cst_51 = arith.constant dense<0.000000e+00> : vector<8x128xf32>
    %61 = tpu.matmul %51, %60, %cst_51 {dimension_numbers = #tpu.dot_dimension_numbers<[1], [0], [0], [1], [0, 0, 1, 1], [], []>} : vector<8x128xf32>, vector<128x128xf32>, vector<8x128xf32> -> vector<8x128xf32>
    %62 = arith.addf %59, %61 : vector<8x128xf32>
    %63 = math.tanh %62 : vector<8x128xf32>
    %c5_i32 = arith.constant 5 : i32
    %64 = arith.index_cast %c5_i32 : i32 to index
    %c0_52 = arith.constant 0 : index
    %c0_53 = arith.constant 0 : index
    %65 = vector.load %arg2[%64, %c0_52, %c0_53] : memref<8x8x8xf32, #tpu.memory_space<vmem>>, vector<1x8x8xf32>
    %66 = vector.shape_cast %65 : vector<1x8x8xf32> to vector<8x8xf32>
    %c0_54 = arith.constant 0 : index
    %c0_55 = arith.constant 0 : index
    %67 = vector.load %arg4[%c0_54, %c0_55] : memref<8x128xf32, #tpu.memory_space<vmem>>, vector<8x128xf32>
    %cst_56 = arith.constant dense<0.000000e+00> : vector<8x128xf32>
    %68 = tpu.matmul %66, %67, %cst_56 {dimension_numbers = #tpu.dot_dimension_numbers<[1], [0], [0], [1], [0, 0, 1, 1], [], []>} : vector<8x8xf32>, vector<8x128xf32>, vector<8x128xf32> -> vector<8x128xf32>
    %c0_57 = arith.constant 0 : index
    %c0_58 = arith.constant 0 : index
    %69 = vector.load %arg6[%c0_57, %c0_58] : memref<1x128xf32, #tpu.memory_space<vmem>>, vector<1x128xf32>
    %70 = vector.broadcast %69 : vector<1x128xf32> to vector<8x128xf32>
    %71 = arith.addf %68, %70 : vector<8x128xf32>
    %c0_59 = arith.constant 0 : index
    %c0_60 = arith.constant 0 : index
    %72 = vector.load %arg5[%c0_59, %c0_60] : memref<128x128xf32, #tpu.memory_space<vmem>>, vector<128x128xf32>
    %cst_61 = arith.constant dense<0.000000e+00> : vector<8x128xf32>
    %73 = tpu.matmul %63, %72, %cst_61 {dimension_numbers = #tpu.dot_dimension_numbers<[1], [0], [0], [1], [0, 0, 1, 1], [], []>} : vector<8x128xf32>, vector<128x128xf32>, vector<8x128xf32> -> vector<8x128xf32>
    %74 = arith.addf %71, %73 : vector<8x128xf32>
    %75 = math.tanh %74 : vector<8x128xf32>
    %c6_i32 = arith.constant 6 : i32
    %76 = arith.index_cast %c6_i32 : i32 to index
    %c0_62 = arith.constant 0 : index
    %c0_63 = arith.constant 0 : index
    %77 = vector.load %arg2[%76, %c0_62, %c0_63] : memref<8x8x8xf32, #tpu.memory_space<vmem>>, vector<1x8x8xf32>
    %78 = vector.shape_cast %77 : vector<1x8x8xf32> to vector<8x8xf32>
    %c0_64 = arith.constant 0 : index
    %c0_65 = arith.constant 0 : index
    %79 = vector.load %arg4[%c0_64, %c0_65] : memref<8x128xf32, #tpu.memory_space<vmem>>, vector<8x128xf32>
    %cst_66 = arith.constant dense<0.000000e+00> : vector<8x128xf32>
    %80 = tpu.matmul %78, %79, %cst_66 {dimension_numbers = #tpu.dot_dimension_numbers<[1], [0], [0], [1], [0, 0, 1, 1], [], []>} : vector<8x8xf32>, vector<8x128xf32>, vector<8x128xf32> -> vector<8x128xf32>
    %c0_67 = arith.constant 0 : index
    %c0_68 = arith.constant 0 : index
    %81 = vector.load %arg6[%c0_67, %c0_68] : memref<1x128xf32, #tpu.memory_space<vmem>>, vector<1x128xf32>
    %82 = vector.broadcast %81 : vector<1x128xf32> to vector<8x128xf32>
    %83 = arith.addf %80, %82 : vector<8x128xf32>
    %c0_69 = arith.constant 0 : index
    %c0_70 = arith.constant 0 : index
    %84 = vector.load %arg5[%c0_69, %c0_70] : memref<128x128xf32, #tpu.memory_space<vmem>>, vector<128x128xf32>
    %cst_71 = arith.constant dense<0.000000e+00> : vector<8x128xf32>
    %85 = tpu.matmul %75, %84, %cst_71 {dimension_numbers = #tpu.dot_dimension_numbers<[1], [0], [0], [1], [0, 0, 1, 1], [], []>} : vector<8x128xf32>, vector<128x128xf32>, vector<8x128xf32> -> vector<8x128xf32>
    %86 = arith.addf %83, %85 : vector<8x128xf32>
    %87 = math.tanh %86 : vector<8x128xf32>
    %c7_i32 = arith.constant 7 : i32
    %88 = arith.index_cast %c7_i32 : i32 to index
    %c0_72 = arith.constant 0 : index
    %c0_73 = arith.constant 0 : index
    %89 = vector.load %arg2[%88, %c0_72, %c0_73] : memref<8x8x8xf32, #tpu.memory_space<vmem>>, vector<1x8x8xf32>
    %90 = vector.shape_cast %89 : vector<1x8x8xf32> to vector<8x8xf32>
    %c0_74 = arith.constant 0 : index
    %c0_75 = arith.constant 0 : index
    %91 = vector.load %arg4[%c0_74, %c0_75] : memref<8x128xf32, #tpu.memory_space<vmem>>, vector<8x128xf32>
    %cst_76 = arith.constant dense<0.000000e+00> : vector<8x128xf32>
    %92 = tpu.matmul %90, %91, %cst_76 {dimension_numbers = #tpu.dot_dimension_numbers<[1], [0], [0], [1], [0, 0, 1, 1], [], []>} : vector<8x8xf32>, vector<8x128xf32>, vector<8x128xf32> -> vector<8x128xf32>
    %c0_77 = arith.constant 0 : index
    %c0_78 = arith.constant 0 : index
    %93 = vector.load %arg6[%c0_77, %c0_78] : memref<1x128xf32, #tpu.memory_space<vmem>>, vector<1x128xf32>
    %94 = vector.broadcast %93 : vector<1x128xf32> to vector<8x128xf32>
    %95 = arith.addf %92, %94 : vector<8x128xf32>
    %c0_79 = arith.constant 0 : index
    %c0_80 = arith.constant 0 : index
    %96 = vector.load %arg5[%c0_79, %c0_80] : memref<128x128xf32, #tpu.memory_space<vmem>>, vector<128x128xf32>
    %cst_81 = arith.constant dense<0.000000e+00> : vector<8x128xf32>
    %97 = tpu.matmul %87, %96, %cst_81 {dimension_numbers = #tpu.dot_dimension_numbers<[1], [0], [0], [1], [0, 0, 1, 1], [], []>} : vector<8x128xf32>, vector<128x128xf32>, vector<8x128xf32> -> vector<8x128xf32>
    %98 = arith.addf %95, %97 : vector<8x128xf32>
    %99 = math.tanh %98 : vector<8x128xf32>
    %c8_i32 = arith.constant 8 : i32
    %c0_82 = arith.constant 0 : index
    %c0_83 = arith.constant 0 : index
    %100 = vector.load %arg8[%c0_82, %c0_83] : memref<8x128xf32, #tpu.memory_space<vmem>>, vector<8x128xf32>
    tpu.vector_store %arg8[%c0_82, %c0_83], %99 {strides = array<i32>} : memref<8x128xf32, #tpu.memory_space<vmem>>, vector<8x128xf32>,
    %c0_i32_84 = arith.constant 0 : i32
    %101 = arith.cmpi eq, %arg1, %c0_i32_84 : i32
    %102 = arith.extui %101 : i1 to i32
    %c0_i32_85 = arith.constant 0 : i32
    %103 = arith.cmpi ne, %102, %c0_i32_85 : i32
    scf.if %103 {
      %c0_86 = arith.constant 0 : index
      %c0_87 = arith.constant 0 : index
      %104 = vector.load %arg7[%c0_86, %c0_87] : memref<8x128xf32, #tpu.memory_space<vmem>>, vector<8x128xf32>
      tpu.vector_store %arg7[%c0_86, %c0_87], %99 {strides = array<i32>} : memref<8x128xf32, #tpu.memory_space<vmem>>, vector<8x128xf32>,
    } else {
    }
    return
  }
  func.func @transform_0(%arg0: i32, %arg1: i32) -> (i32, i32, i32) {
    %c0_i32 = arith.constant 0 : i32
    %c0_i32_0 = arith.constant 0 : i32
    return %arg1, %arg0, %c0_i32 : i32, i32, i32
  }
  func.func @transform_1(%arg0: i32, %arg1: i32) -> (i32, i32) {
    %c0_i32 = arith.constant 0 : i32
    %c0_i32_0 = arith.constant 0 : i32
    return %arg0, %c0_i32 : i32, i32
  }
  func.func @transform_2(%arg0: i32, %arg1: i32) -> (i32, i32) {
    %c0_i32 = arith.constant 0 : i32
    %c0_i32_0 = arith.constant 0 : i32
    %c0_i32_1 = arith.constant 0 : i32
    return %c0_i32, %c0_i32_0 : i32, i32
  }
  func.func @transform_3(%arg0: i32, %arg1: i32) -> (i32, i32) {
    %c0_i32 = arith.constant 0 : i32
    %c0_i32_0 = arith.constant 0 : i32
    %c0_i32_1 = arith.constant 0 : i32
    return %c0_i32, %c0_i32_0 : i32, i32
  }
  func.func @transform_4(%arg0: i32, %arg1: i32) -> (i32, i32) {
    %c0_i32 = arith.constant 0 : i32
    %c0_i32_0 = arith.constant 0 : i32
    %c0_i32_1 = arith.constant 0 : i32
    return %c0_i32, %c0_i32_0 : i32, i32
  }
  func.func @transform_5(%arg0: i32, %arg1: i32) -> (i32, i32) {
    %c0_i32 = arith.constant 0 : i32
    %c0_i32_0 = arith.constant 0 : i32
    return %arg0, %c0_i32 : i32, i32
  }
}

</mosaic_0001>

<bundles_post_ra>
// kernel: _rnn_forward_impl.1
= control target key start
LH: loop header
LB: loop body
LE: loop exit
PB: predicated region body
PF: predicated region fallthrough
CT: control target
= control target key end

     0   :  { %10 = vsyncpa [#allocation4], 0  ;;  %s1782_s18 = smov [#allocation3]   ;;  %s2224_s0 = inlined_call_operand.vmem [shape: f32[8,8,8], index: 0, kind: input, shape index: {}]   ;;  %s2225_s1 = inlined_call_operand.vmem [shape: f32[8,128], index: 1, kind: input, shape index: {}]   ;;  %s2226_s2 = inlined_call_operand.vmem [shape: f32[8,128], index: 2, kind: input, shape index: {}]   ;;  %s2227_s3 = inlined_call_operand.hbm [shape: f32[128,128], index: 3, kind: input, shape index: {}]   ;;  %s2228_s4 = inlined_call_operand.vmem [shape: f32[1,128], index: 4, kind: input, shape index: {}]   ;;  %s2229_s5 = inlined_call_operand.vmem [shape: f32[8,128], index: 5, kind: output, shape index: {}]  }
   0x1   :  { %s22_s19 = sshll.u32 %s1782_s18, 4  ;;  %s23_s19 = int_to_ptr.vmem [resolvable:$true] %s22_s19 }
   0x2   :  { %s1768_s20 = scalar_lea.vmem %s23_s19, 2048  ;;  %p1773_p1 = scmp.lt.s32.totalorder %s23_s19, %s23_s19 }
   0x3   :  { %p1769_p0 = scmp.ne.s32.totalorder %s23_s19, %s1768_s20  ;;  %p1774_p2 = scmp.lt.s32.totalorder %s1768_s20, %s1768_s20 }
   0x5   :  { %p1775_p3 = por %p1774_p2, %p1773_p1 }
   0x7   :  { %p1776_p4 = pnand %p1775_p3, %p1769_p0 }
   0x9   :  { %1779 = shalt.err (!%p1776_p4)
}
   0xa   :  { %s1783_s21 = smov 128   ;;  %s1784_s22 = smov 8  }
   0xb   :  { %28 = dma.hbm_to_vmem [thread:$0]  %s2227_s3, 2048, %s23_s19, [#allocation4], %s1783_s21, %s1783_s21, %s1784_s22  }
   0xc   :  { %1780 = dma.done.wait [#allocation4], 2048  }
   0xd   :  { %1781 = vsyncadd [#allocation4], 4294965248  ;;  %v1785_v0 = vmov 0.0   ;;  %vm1786_vm0 = vmmov 0   ;;  %vm50_vm1 = vcmask 64512   ;;  %v1829_v1 = vld [vmem:[%s2226_s2] sm:$0xff] }
   0xe   :  { %1419 = vmatprep.subr.mxu1 %v1785_v0  ;;  %1421 = vmatprep.mubr.msk.f32.mxu1 %vm1786_vm0, %v1785_v0  ;;  %v41_v2 = vld [vmem:[%s2224_s0] sm:$0xff]  ;;  %v1834_v3 = vld [vmem:[#allocation3 + $0x78] sm:$0xff]  ;;  %v1840_v4 = vld [vmem:[#allocation3 + $0x70] sm:$0xff] }
   0xf   :  { %1459 = vmatprep.subr.mxu0 %v1785_v0  ;;  %1461 = vmatprep.mubr.msk.f32.mxu0 %vm1786_vm0, %v1785_v0  ;;  %v1846_v5 = vld [vmem:[#allocation3 + $0x68] sm:$0xff]  ;;  %v1851_v6 = vld [vmem:[#allocation3 + $0x60] sm:$0xff]  ;;  %v1855_v7 = vld [vmem:[#allocation3 + $0x58] sm:$0xff] }
  0x10   :  { %1420 = vmatpush3.msra.mxu1 %v1829_v1  ;;  %1460 = vmatpush3.msra.mxu0 %v1829_v1  ;;  %v1859_v8 = vld [vmem:[#allocation3 + $0x50] sm:$0xff]  ;;  %v1863_v9 = vld [vmem:[#allocation3 + $0x48] sm:$0xff]  ;;  %v1867_v10 = vld [vmem:[#allocation3 + $0x40] sm:$0xff] }
  0x11   :  { %1422 = vmatmul.mubr.msk.f32.vlgmr.msra.gmra.mxu1 %vm50_vm1, %v41_v2  ;;  %1424 = vmatprep.subr.mxu1 %v1785_v0  ;;  %v1871_v11 = vld [vmem:[#allocation3 + $0x38] sm:$0xff]  ;;  %v1875_v12 = vld [vmem:[#allocation3 + $0x30] sm:$0xff]  ;;  %v1879_v13 = vld [vmem:[#allocation3 + $0x28] sm:$0xff] }
  0x12   :  { %1425 = vmatpush3.msra.mxu1 %v1834_v3  ;;  %1456 = vmatprep.mubr.msk.f32.mxu1 %vm1786_vm0, %v1785_v0  ;;  %v1883_v14 = vld [vmem:[#allocation3 + $0x20] sm:$0xff]  ;;  %v1887_v15 = vld [vmem:[#allocation3 + $0x18] sm:$0xff]  ;;  %v1891_v16 = vld [vmem:[#allocation3 + $0x10] sm:$0xff] }
  0x13   :  { %1426 = vmatprep.subr.mxu1 %v1785_v0  ;;  %1464 = vmatprep.subr.mxu0 %v1785_v0  ;;  %v1895_v17 = vld [vmem:[#allocation3 + $0x8] sm:$0xff]  ;;  %v1899_v18 = vld [vmem:[#allocation3] sm:$0xff]  ;;  %v1255_v21 = vld [vmem:[%s2224_s0 + $0x10] sm:$0xff] }
  0x14   :  { %1427 = vmatpush3.msra.mxu1 %v1840_v4  ;;  %v38_v19 = vld [vmem:[%s2225_s1] sm:$0xff]  ;;  %v1253_v20 = vld [vmem:[%s2224_s0 + $0x8] sm:$0xff]  ;;  %v1257_v32 = vld [vmem:[%s2224_s0 + $0x18] sm:$0xff] }
  0x15   :  { %1428 = vmatprep.subr.mxu1 %v1785_v0  ;;  %1462 = vmatmul.mubr.msk.f32.vlgmr.msra.gmra.mxu0 %vm50_vm1, %v1253_v20  ;;  %v1991_v24 = vld [vmem:[%s2228_s4] ss:$0 sm:$0xff]  ;;  %v1261_v49 = vld [vmem:[%s2224_s0 + $0x28] sm:$0xff]  ;;  %v1263_v57 = vld [vmem:[%s2224_s0 + $0x30] sm:$0xff] }
  0x16   :  { %1429 = vmatpush3.msra.mxu1 %v1846_v5  ;;  %1465 = vmatpush3.msra.mxu0 %v1834_v3  ;;  %v1259_v41 = vld [vmem:[%s2224_s0 + $0x20] sm:$0xff] }
  0x17   :  { %1430 = vmatprep.subr.mxu1 %v1785_v0  ;;  %1496 = vmatprep.mubr.msk.f32.mxu0 %vm1786_vm0, %v1785_v0 }
  0x18   :  { %1431 = vmatpush3.msra.mxu1 %v1851_v6  ;;  %1466 = vmatprep.subr.mxu0 %v1785_v0 }
  0x19   :  { %1432 = vmatprep.subr.mxu1 %v1785_v0  ;;  %1467 = vmatpush3.msra.mxu0 %v1840_v4 }
  0x1a   :  { %1433 = vmatpush3.msra.mxu1 %v1855_v7  ;;  %1468 = vmatprep.subr.mxu0 %v1785_v0 }
  0x1b   :  { %1434 = vmatprep.subr.mxu1 %v1785_v0  ;;  %1469 = vmatpush3.msra.mxu0 %v1846_v5 }
  0x1c   :  { %1435 = vmatpush3.msra.mxu1 %v1859_v8  ;;  %1470 = vmatprep.subr.mxu0 %v1785_v0 }
  0x1d   :  { %1436 = vmatprep.subr.mxu1 %v1785_v0  ;;  %1471 = vmatpush3.msra.mxu0 %v1851_v6 }
  0x1e   :  { %1437 = vmatpush3.msra.mxu1 %v1863_v9  ;;  %1472 = vmatprep.subr.mxu0 %v1785_v0 }
  0x1f   :  { %1438 = vmatprep.subr.mxu1 %v1785_v0  ;;  %1473 = vmatpush3.msra.mxu0 %v1855_v7 }
  0x20   :  { %1439 = vmatpush3.msra.mxu1 %v1867_v10  ;;  %1474 = vmatprep.subr.mxu0 %v1785_v0 }
  0x21   :  { %1440 = vmatprep.subr.mxu1 %v1785_v0  ;;  %1475 = vmatpush3.msra.mxu0 %v1859_v8 }
  0x22   :  { %1441 = vmatpush3.msra.mxu1 %v1871_v11  ;;  %1476 = vmatprep.subr.mxu0 %v1785_v0 }
  0x23   :  { %1442 = vmatprep.subr.mxu1 %v1785_v0  ;;  %1477 = vmatpush3.msra.mxu0 %v1863_v9 }
  0x24   :  { %1443 = vmatpush3.msra.mxu1 %v1875_v12  ;;  %1478 = vmatprep.subr.mxu0 %v1785_v0 }
  0x25   :  { %1444 = vmatprep.subr.mxu1 %v1785_v0  ;;  %1479 = vmatpush3.msra.mxu0 %v1867_v10 }
  0x26   :  { %1445 = vmatpush3.msra.mxu1 %v1879_v13  ;;  %1480 = vmatprep.subr.mxu0 %v1785_v0 }
  0x27   :  { %1446 = vmatprep.subr.mxu1 %v1785_v0  ;;  %1481 = vmatpush3.msra.mxu0 %v1871_v11 }
  0x28   :  { %1447 = vmatpush3.msra.mxu1 %v1883_v14  ;;  %1482 = vmatprep.subr.mxu0 %v1785_v0 }
  0x29   :  { %1448 = vmatprep.subr.mxu1 %v1785_v0  ;;  %1483 = vmatpush3.msra.mxu0 %v1875_v12 }
  0x2a   :  { %1449 = vmatpush3.msra.mxu1 %v1887_v15  ;;  %1484 = vmatprep.subr.mxu0 %v1785_v0 }
  0x2b   :  { %1450 = vmatprep.subr.mxu1 %v1785_v0  ;;  %1485 = vmatpush3.msra.mxu0 %v1879_v13 }
  0x2c   :  { %1451 = vmatpush3.msra.mxu1 %v1891_v16  ;;  %1486 = vmatprep.subr.mxu0 %v1785_v0 }
  0x2d   :  { %1452 = vmatprep.subr.mxu1 %v1785_v0  ;;  %1487 = vmatpush3.msra.mxu0 %v1883_v14 }
  0x2e   :  { %1453 = vmatpush3.msra.mxu1 %v1895_v17  ;;  %1488 = vmatprep.subr.mxu0 %v1785_v0 }
  0x2f   :  { %1454 = vmatprep.subr.mxu1 %v1785_v0  ;;  %1489 = vmatpush3.msra.mxu0 %v1887_v15 }
  0x30   :  { %1455 = vmatpush3.msra.mxu1 %v1899_v18  ;;  %1490 = vmatprep.subr.mxu0 %v1785_v0 }
  0x31   :  { %1457 = vmatmul.mubr.f32.vlgmr.msra.gmra.mxu1 %v38_v19  ;;  %1499 = vmatprep.subr.mxu1 %v1785_v0  ;;  %v1265_v19 = vld [vmem:[%s2224_s0 + $0x38] sm:$0xff] }
  0x32   :  { %1500 = vmatpush3.msra.mxu1 %v1829_v1  ;;  %1501 = vmatprep.mubr.msk.f32.mxu1 %vm1786_vm0, %v1785_v0 }
  0x33   :  { %1504 = vmatprep.subr.mxu1 %v1785_v0  ;;  %1491 = vmatpush3.msra.mxu0 %v1891_v16 }
  0x34   :  { %1492 = vmatprep.subr.mxu0 %v1785_v0 }
  0x35   :  { %1493 = vmatpush3.msra.mxu0 %v1895_v17  ;;  %1502 = vmatmul.mubr.msk.f32.vlgmr.msra.gmra.mxu1 %vm50_vm1, %v1255_v21 }
  0x36   :  { %1494 = vmatprep.subr.mxu0 %v1785_v0  ;;  %1505 = vmatpush3.msra.mxu1 %v1834_v3 }
  0x37   :  { %1495 = vmatpush3.msra.mxu0 %v1899_v18  ;;  %1536 = vmatprep.mubr.msk.f32.mxu1 %vm1786_vm0, %v1785_v0 }
  0x38   :  { %1539 = vmatprep.subr.mxu0 %v1785_v0  ;;  %1506 = vmatprep.subr.mxu1 %v1785_v0 }
  0x39   :  { %1507 = vmatpush3.msra.mxu1 %v1840_v4 }
  0x3a   :  { %1508 = vmatprep.subr.mxu1 %v1785_v0 }
  0x3b   :  { %1509 = vmatpush3.msra.mxu1 %v1846_v5 }
  0x3c   :  { %1510 = vmatprep.subr.mxu1 %v1785_v0 }
  0x3d   :  { %1511 = vmatpush3.msra.mxu1 %v1851_v6 }
  0x3e   :  { %1512 = vmatprep.subr.mxu1 %v1785_v0 }
  0x3f   :  { %1513 = vmatpush3.msra.mxu1 %v1855_v7 }
  0x40   :  { %1514 = vmatprep.subr.mxu1 %v1785_v0 }
  0x41   :  { %1515 = vmatpush3.msra.mxu1 %v1859_v8 }
  0x42   :  { %1516 = vmatprep.subr.mxu1 %v1785_v0 }
  0x43   :  { %1517 = vmatpush3.msra.mxu1 %v1863_v9 }
  0x44   :  { %1518 = vmatprep.subr.mxu1 %v1785_v0 }
  0x45   :  { %1519 = vmatpush3.msra.mxu1 %v1867_v10 }
  0x46   :  { %1520 = vmatprep.subr.mxu1 %v1785_v0 }
  0x47   :  { %1521 = vmatpush3.msra.mxu1 %v1871_v11 }
  0x48   :  { %1522 = vmatprep.subr.mxu1 %v1785_v0 }
  0x49   :  { %1523 = vmatpush3.msra.mxu1 %v1875_v12 }
  0x4a   :  { %1524 = vmatprep.subr.mxu1 %v1785_v0 }
  0x4b   :  { %1525 = vmatpush3.msra.mxu1 %v1879_v13 }
  0x4c   :  { %1526 = vmatprep.subr.mxu1 %v1785_v0 }
  0x4d   :  { %1527 = vmatpush3.msra.mxu1 %v1883_v14 }
  0x4e   :  { %1528 = vmatprep.subr.mxu1 %v1785_v0 }
  0x4f   :  { %1529 = vmatpush3.msra.mxu1 %v1887_v15 }
  0x50   :  { %1530 = vmatprep.subr.mxu1 %v1785_v0 }
  0x51   :  { %1531 = vmatpush3.msra.mxu1 %v1891_v16 }
  0x52   :  { %1532 = vmatprep.subr.mxu1 %v1785_v0 }
  0x53   :  { %1533 = vmatpush3.msra.mxu1 %v1895_v17 }
  0x54   :  { %1534 = vmatprep.subr.mxu1 %v1785_v0 }
  0x55   :  { %1535 = vmatpush3.msra.mxu1 %v1899_v18 }
  0x56   :  { %1579 = vmatprep.subr.mxu1 %v1785_v0 }
  0xd1   :  { %v120_v22 = vpop.f32.mrf.mxu1 }
  0xd2   :  { %v121_v25 = vadd.f32 %v1991_v24, %v120_v22 }
  0xd3   :  { %v1423_v23 = vpop.f32.mrf.mxu1 }
  0xd5   :  { %v283_v30 = vpop.f32.mrf.mxu0 }
  0xd6   :  { %v284_v35 = vadd.f32 %v1991_v24, %v283_v30 }
  0xd7   :  { %v1463_v31 = vpop.f32.mrf.mxu0 }
  0xf1   :  { %v206_v26 = vpop.f32.mrf.mxu1 }
  0xf2   :  { %v210_v27 = vadd.f32 %v206_v26, %v121_v25 }
  0xf3   :  { %v1458_v28 = vpop.f32.mrf.mxu1 }
  0xf4   :  { %1744 = vtanh.f32 %v210_v27 }
  0xf5   :  { %v2006_v33 = vpop.f32.mrf.mxu1 }
  0xf6   :  { %v431_v43 = vadd.f32 %v1991_v24, %v2006_v33 }
  0xf7   :  { %v1503_v34 = vpop.f32.mrf.mxu1 }
 0x101   :  { %v1745_v29 = vpop.eup %1744 }
 0x102   :  { %1497 = vmatmul.mubr.f32.vlgmr.msra.gmra.mxu0 %v1745_v29 }
 0x103   :  { %1540 = vmatpush3.msra.mxu0 %v1829_v1  ;;  %1541 = vmatprep.mubr.msk.f32.mxu0 %vm1786_vm0, %v1785_v0 }
 0x104   :  { %1544 = vmatprep.subr.mxu0 %v1785_v0 }
 0x106   :  { %1542 = vmatmul.mubr.msk.f32.vlgmr.msra.gmra.mxu0 %vm50_vm1, %v1257_v32 }
 0x107   :  { %1545 = vmatpush3.msra.mxu0 %v1834_v3  ;;  %1576 = vmatprep.mubr.msk.f32.mxu0 %vm1786_vm0, %v1785_v0 }
 0x108   :  { %1546 = vmatprep.subr.mxu0 %v1785_v0 }
 0x109   :  { %1547 = vmatpush3.msra.mxu0 %v1840_v4 }
 0x10a   :  { %1548 = vmatprep.subr.mxu0 %v1785_v0 }
 0x10b   :  { %1549 = vmatpush3.msra.mxu0 %v1846_v5 }
 0x10c   :  { %1550 = vmatprep.subr.mxu0 %v1785_v0 }
 0x10d   :  { %1551 = vmatpush3.msra.mxu0 %v1851_v6 }
 0x10e   :  { %1552 = vmatprep.subr.mxu0 %v1785_v0 }
 0x10f   :  { %1553 = vmatpush3.msra.mxu0 %v1855_v7 }
 0x110   :  { %1554 = vmatprep.subr.mxu0 %v1785_v0 }
 0x111   :  { %1555 = vmatpush3.msra.mxu0 %v1859_v8 }
 0x112   :  { %1556 = vmatprep.subr.mxu0 %v1785_v0 }
 0x113   :  { %1557 = vmatpush3.msra.mxu0 %v1863_v9 }
 0x114   :  { %1558 = vmatprep.subr.mxu0 %v1785_v0 }
 0x115   :  { %1559 = vmatpush3.msra.mxu0 %v1867_v10 }
 0x116   :  { %1560 = vmatprep.subr.mxu0 %v1785_v0 }
 0x117   :  { %1561 = vmatpush3.msra.mxu0 %v1871_v11 }
 0x118   :  { %1562 = vmatprep.subr.mxu0 %v1785_v0 }
 0x119   :  { %1563 = vmatpush3.msra.mxu0 %v1875_v12 }
 0x11a   :  { %1564 = vmatprep.subr.mxu0 %v1785_v0 }
 0x11b   :  { %1565 = vmatpush3.msra.mxu0 %v1879_v13 }
 0x11c   :  { %1566 = vmatprep.subr.mxu0 %v1785_v0 }
 0x11d   :  { %1567 = vmatpush3.msra.mxu0 %v1883_v14 }
 0x11e   :  { %1568 = vmatprep.subr.mxu0 %v1785_v0 }
 0x11f   :  { %1569 = vmatpush3.msra.mxu0 %v1887_v15 }
 0x120   :  { %1570 = vmatprep.subr.mxu0 %v1785_v0 }
 0x121   :  { %1571 = vmatpush3.msra.mxu0 %v1891_v16 }
 0x122   :  { %1572 = vmatprep.subr.mxu0 %v1785_v0 }
 0x123   :  { %1573 = vmatpush3.msra.mxu0 %v1895_v17 }
 0x124   :  { %1574 = vmatprep.subr.mxu0 %v1785_v0 }
 0x125   :  { %1575 = vmatpush3.msra.mxu0 %v1899_v18 }
 0x126   :  { %1619 = vmatprep.subr.mxu0 %v1785_v0 }
 0x1c2   :  { %v353_v36 = vpop.f32.mrf.mxu0 }
 0x1c3   :  { %v357_v37 = vadd.f32 %v353_v36, %v284_v35 }
 0x1c4   :  { %v1498_v38 = vpop.f32.mrf.mxu0 }
 0x1c5   :  { %1746 = vtanh.f32 %v357_v37 }
 0x1c6   :  { %v2043_v40 = vpop.f32.mrf.mxu0 }
 0x1c7   :  { %v578_v51 = vadd.f32 %v1991_v24, %v2043_v40 }
 0x1c8   :  { %v1543_v42 = vpop.f32.mrf.mxu0 }
 0x1d2   :  { %v1747_v39 = vpop.eup %1746 }
 0x1d3   :  { %1537 = vmatmul.mubr.f32.vlgmr.msra.gmra.mxu1 %v1747_v39 }
 0x1d4   :  { %1580 = vmatpush3.msra.mxu1 %v1829_v1  ;;  %1581 = vmatprep.mubr.msk.f32.mxu1 %vm1786_vm0, %v1785_v0 }
 0x1d5   :  { %1584 = vmatprep.subr.mxu1 %v1785_v0 }
 0x1d7   :  { %1582 = vmatmul.mubr.msk.f32.vlgmr.msra.gmra.mxu1 %vm50_vm1, %v1259_v41 }
 0x1d8   :  { %1585 = vmatpush3.msra.mxu1 %v1834_v3  ;;  %1616 = vmatprep.mubr.msk.f32.mxu1 %vm1786_vm0, %v1785_v0 }
 0x1d9   :  { %1586 = vmatprep.subr.mxu1 %v1785_v0 }
 0x1da   :  { %1587 = vmatpush3.msra.mxu1 %v1840_v4 }
 0x1db   :  { %1588 = vmatprep.subr.mxu1 %v1785_v0 }
 0x1dc   :  { %1589 = vmatpush3.msra.mxu1 %v1846_v5 }
 0x1dd   :  { %1590 = vmatprep.subr.mxu1 %v1785_v0 }
 0x1de   :  { %1591 = vmatpush3.msra.mxu1 %v1851_v6 }
 0x1df   :  { %1592 = vmatprep.subr.mxu1 %v1785_v0 }
 0x1e0   :  { %1593 = vmatpush3.msra.mxu1 %v1855_v7 }
 0x1e1   :  { %1594 = vmatprep.subr.mxu1 %v1785_v0 }
 0x1e2   :  { %1595 = vmatpush3.msra.mxu1 %v1859_v8 }
 0x1e3   :  { %1596 = vmatprep.subr.mxu1 %v1785_v0 }
 0x1e4   :  { %1597 = vmatpush3.msra.mxu1 %v1863_v9 }
 0x1e5   :  { %1598 = vmatprep.subr.mxu1 %v1785_v0 }
 0x1e6   :  { %1599 = vmatpush3.msra.mxu1 %v1867_v10 }
 0x1e7   :  { %1600 = vmatprep.subr.mxu1 %v1785_v0 }
 0x1e8   :  { %1601 = vmatpush3.msra.mxu1 %v1871_v11 }
 0x1e9   :  { %1602 = vmatprep.subr.mxu1 %v1785_v0 }
 0x1ea   :  { %1603 = vmatpush3.msra.mxu1 %v1875_v12 }
 0x1eb   :  { %1604 = vmatprep.subr.mxu1 %v1785_v0 }
 0x1ec   :  { %1605 = vmatpush3.msra.mxu1 %v1879_v13 }
 0x1ed   :  { %1606 = vmatprep.subr.mxu1 %v1785_v0 }
 0x1ee   :  { %1607 = vmatpush3.msra.mxu1 %v1883_v14 }
 0x1ef   :  { %1608 = vmatprep.subr.mxu1 %v1785_v0 }
 0x1f0   :  { %1609 = vmatpush3.msra.mxu1 %v1887_v15 }
 0x1f1   :  { %1610 = vmatprep.subr.mxu1 %v1785_v0 }
 0x1f2   :  { %1611 = vmatpush3.msra.mxu1 %v1891_v16 }
 0x1f3   :  { %1612 = vmatprep.subr.mxu1 %v1785_v0 }
 0x1f4   :  { %1613 = vmatpush3.msra.mxu1 %v1895_v17 }
 0x1f5   :  { %1614 = vmatprep.subr.mxu1 %v1785_v0 }
 0x1f6   :  { %1615 = vmatpush3.msra.mxu1 %v1899_v18 }
 0x1f7   :  { %1659 = vmatprep.subr.mxu1 %v1785_v0 }
 0x293   :  { %v500_v44 = vpop.f32.mrf.mxu1 }
 0x294   :  { %v504_v45 = vadd.f32 %v500_v44, %v431_v43 }
 0x295   :  { %v1538_v46 = vpop.f32.mrf.mxu1 }
 0x296   :  { %1748 = vtanh.f32 %v504_v45 }
 0x297   :  { %v2089_v48 = vpop.f32.mrf.mxu1 }
 0x298   :  { %v725_v59 = vadd.f32 %v1991_v24, %v2089_v48 }
 0x299   :  { %v1583_v50 = vpop.f32.mrf.mxu1 }
 0x2a3   :  { %v1749_v47 = vpop.eup %1748 }
 0x2a4   :  { %1577 = vmatmul.mubr.f32.vlgmr.msra.gmra.mxu0 %v1749_v47 }
 0x2a5   :  { %1620 = vmatpush3.msra.mxu0 %v1829_v1  ;;  %1621 = vmatprep.mubr.msk.f32.mxu0 %vm1786_vm0, %v1785_v0 }
 0x2a6   :  { %1624 = vmatprep.subr.mxu0 %v1785_v0 }
 0x2a8   :  { %1622 = vmatmul.mubr.msk.f32.vlgmr.msra.gmra.mxu0 %vm50_vm1, %v1261_v49 }
 0x2a9   :  { %1625 = vmatpush3.msra.mxu0 %v1834_v3  ;;  %1656 = vmatprep.mubr.msk.f32.mxu0 %vm1786_vm0, %v1785_v0 }
 0x2aa   :  { %1626 = vmatprep.subr.mxu0 %v1785_v0 }
 0x2ab   :  { %1627 = vmatpush3.msra.mxu0 %v1840_v4 }
 0x2ac   :  { %1628 = vmatprep.subr.mxu0 %v1785_v0 }
 0x2ad   :  { %1629 = vmatpush3.msra.mxu0 %v1846_v5 }
 0x2ae   :  { %1630 = vmatprep.subr.mxu0 %v1785_v0 }
 0x2af   :  { %1631 = vmatpush3.msra.mxu0 %v1851_v6 }
 0x2b0   :  { %1632 = vmatprep.subr.mxu0 %v1785_v0 }
 0x2b1   :  { %1633 = vmatpush3.msra.mxu0 %v1855_v7 }
 0x2b2   :  { %1634 = vmatprep.subr.mxu0 %v1785_v0 }
 0x2b3   :  { %1635 = vmatpush3.msra.mxu0 %v1859_v8 }
 0x2b4   :  { %1636 = vmatprep.subr.mxu0 %v1785_v0 }
 0x2b5   :  { %1637 = vmatpush3.msra.mxu0 %v1863_v9 }
 0x2b6   :  { %1638 = vmatprep.subr.mxu0 %v1785_v0 }
 0x2b7   :  { %1639 = vmatpush3.msra.mxu0 %v1867_v10 }
 0x2b8   :  { %1640 = vmatprep.subr.mxu0 %v1785_v0 }
 0x2b9   :  { %1641 = vmatpush3.msra.mxu0 %v1871_v11 }
 0x2ba   :  { %1642 = vmatprep.subr.mxu0 %v1785_v0 }
 0x2bb   :  { %1643 = vmatpush3.msra.mxu0 %v1875_v12 }
 0x2bc   :  { %1644 = vmatprep.subr.mxu0 %v1785_v0 }
 0x2bd   :  { %1645 = vmatpush3.msra.mxu0 %v1879_v13 }
 0x2be   :  { %1646 = vmatprep.subr.mxu0 %v1785_v0 }
 0x2bf   :  { %1647 = vmatpush3.msra.mxu0 %v1883_v14 }
 0x2c0   :  { %1648 = vmatprep.subr.mxu0 %v1785_v0 }
 0x2c1   :  { %1649 = vmatpush3.msra.mxu0 %v1887_v15 }
 0x2c2   :  { %1650 = vmatprep.subr.mxu0 %v1785_v0 }
 0x2c3   :  { %1651 = vmatpush3.msra.mxu0 %v1891_v16 }
 0x2c4   :  { %1652 = vmatprep.subr.mxu0 %v1785_v0 }
 0x2c5   :  { %1653 = vmatpush3.msra.mxu0 %v1895_v17 }
 0x2c6   :  { %1654 = vmatprep.subr.mxu0 %v1785_v0 }
 0x2c7   :  { %1655 = vmatpush3.msra.mxu0 %v1899_v18 }
 0x2c8   :  { %1699 = vmatprep.subr.mxu0 %v1785_v0 }
 0x364   :  { %v647_v52 = vpop.f32.mrf.mxu0 }
 0x365   :  { %v651_v53 = vadd.f32 %v647_v52, %v578_v51 }
 0x366   :  { %v1578_v54 = vpop.f32.mrf.mxu0 }
 0x367   :  { %1750 = vtanh.f32 %v651_v53 }
 0x368   :  { %v2135_v56 = vpop.f32.mrf.mxu0 }
 0x36a   :  { %v1623_v58 = vpop.f32.mrf.mxu0 }
 0x374   :  { %v1751_v55 = vpop.eup %1750 }
 0x375   :  { %1617 = vmatmul.mubr.f32.vlgmr.msra.gmra.mxu1 %v1751_v55 }
 0x376   :  { %1660 = vmatpush3.msra.mxu1 %v1829_v1  ;;  %1661 = vmatprep.mubr.msk.f32.mxu1 %vm1786_vm0, %v1785_v0 }
 0x377   :  { %1664 = vmatprep.subr.mxu1 %v1785_v0 }
 0x379   :  { %1662 = vmatmul.mubr.msk.f32.vlgmr.msra.gmra.mxu1 %vm50_vm1, %v1263_v57 }
 0x37a   :  { %1665 = vmatpush3.msra.mxu1 %v1834_v3  ;;  %1696 = vmatprep.mubr.msk.f32.mxu1 %vm1786_vm0, %v1785_v0 }
 0x37b   :  { %1666 = vmatprep.subr.mxu1 %v1785_v0 }
 0x37c   :  { %1667 = vmatpush3.msra.mxu1 %v1840_v4 }
 0x37d   :  { %1668 = vmatprep.subr.mxu1 %v1785_v0 }
 0x37e   :  { %1669 = vmatpush3.msra.mxu1 %v1846_v5 }
 0x37f   :  { %1670 = vmatprep.subr.mxu1 %v1785_v0 }
 0x380   :  { %1671 = vmatpush3.msra.mxu1 %v1851_v6 }
 0x381   :  { %1672 = vmatprep.subr.mxu1 %v1785_v0 }
 0x382   :  { %1673 = vmatpush3.msra.mxu1 %v1855_v7 }
 0x383   :  { %1674 = vmatprep.subr.mxu1 %v1785_v0 }
 0x384   :  { %1675 = vmatpush3.msra.mxu1 %v1859_v8 }
 0x385   :  { %1676 = vmatprep.subr.mxu1 %v1785_v0 }
 0x386   :  { %1677 = vmatpush3.msra.mxu1 %v1863_v9 }
 0x387   :  { %1678 = vmatprep.subr.mxu1 %v1785_v0 }
 0x388   :  { %1679 = vmatpush3.msra.mxu1 %v1867_v10 }
 0x389   :  { %1680 = vmatprep.subr.mxu1 %v1785_v0 }
 0x38a   :  { %1681 = vmatpush3.msra.mxu1 %v1871_v11 }
 0x38b   :  { %1682 = vmatprep.subr.mxu1 %v1785_v0 }
 0x38c   :  { %1683 = vmatpush3.msra.mxu1 %v1875_v12 }
 0x38d   :  { %1684 = vmatprep.subr.mxu1 %v1785_v0 }
 0x38e   :  { %1685 = vmatpush3.msra.mxu1 %v1879_v13 }
 0x38f   :  { %1686 = vmatprep.subr.mxu1 %v1785_v0 }
 0x390   :  { %1687 = vmatpush3.msra.mxu1 %v1883_v14 }
 0x391   :  { %1688 = vmatprep.subr.mxu1 %v1785_v0 }
 0x392   :  { %1689 = vmatpush3.msra.mxu1 %v1887_v15 }
 0x393   :  { %1690 = vmatprep.subr.mxu1 %v1785_v0 }
 0x394   :  { %1691 = vmatpush3.msra.mxu1 %v1891_v16 }
 0x395   :  { %1692 = vmatprep.subr.mxu1 %v1785_v0 }
 0x396   :  { %1693 = vmatpush3.msra.mxu1 %v1895_v17 }
 0x397   :  { %1694 = vmatprep.subr.mxu1 %v1785_v0 }
 0x398   :  { %1695 = vmatpush3.msra.mxu1 %v1899_v18 }
 0x435   :  { %v794_v60 = vpop.f32.mrf.mxu1 }
 0x436   :  { %v798_v61 = vadd.f32 %v794_v60, %v725_v59 }
 0x437   :  { %v1618_v62 = vpop.f32.mrf.mxu1 }
 0x438   :  { %1752 = vtanh.f32 %v798_v61 }
 0x439   :  { %v1018_v2 = vpop.f32.mrf.mxu1 }
 0x43b   :  { %v1663_v20 = vpop.f32.mrf.mxu1 }
 0x445   :  { %v1753_v63 = vpop.eup %1752 }
 0x446   :  { %1657 = vmatmul.mubr.f32.vlgmr.msra.gmra.mxu0 %v1753_v63 }
 0x447   :  { %1700 = vmatpush3.msra.mxu0 %v1829_v1  ;;  %1701 = vmatprep.mubr.msk.f32.mxu0 %vm1786_vm0, %v1785_v0  ;;  %v872_v1 = vadd.f32 %v1991_v24, %v2135_v56 }
 0x448   :  { %1704 = vmatprep.subr.mxu0 %v1785_v0 }
 0x44a   :  { %1702 = vmatmul.mubr.msk.f32.vlgmr.msra.gmra.mxu0 %vm50_vm1, %v1265_v19 }
 0x44b   :  { %1705 = vmatpush3.msra.mxu0 %v1834_v3  ;;  %1736 = vmatprep.mubr.msk.f32.mxu0 %vm1786_vm0, %v1785_v0 }
 0x44c   :  { %1706 = vmatprep.subr.mxu0 %v1785_v0 }
 0x44d   :  { %1707 = vmatpush3.msra.mxu0 %v1840_v4 }
 0x44e   :  { %1708 = vmatprep.subr.mxu0 %v1785_v0 }
 0x44f   :  { %1709 = vmatpush3.msra.mxu0 %v1846_v5 }
 0x450   :  { %1710 = vmatprep.subr.mxu0 %v1785_v0 }
 0x451   :  { %1711 = vmatpush3.msra.mxu0 %v1851_v6 }
 0x452   :  { %1712 = vmatprep.subr.mxu0 %v1785_v0 }
 0x453   :  { %1713 = vmatpush3.msra.mxu0 %v1855_v7 }
 0x454   :  { %1714 = vmatprep.subr.mxu0 %v1785_v0 }
 0x455   :  { %1715 = vmatpush3.msra.mxu0 %v1859_v8 }
 0x456   :  { %1716 = vmatprep.subr.mxu0 %v1785_v0 }
 0x457   :  { %1717 = vmatpush3.msra.mxu0 %v1863_v9  ;;  %v1019_v9 = vadd.f32 %v1991_v24, %v1018_v2 }
 0x458   :  { %1718 = vmatprep.subr.mxu0 %v1785_v0 }
 0x459   :  { %1719 = vmatpush3.msra.mxu0 %v1867_v10 }
 0x45a   :  { %1720 = vmatprep.subr.mxu0 %v1785_v0 }
 0x45b   :  { %1721 = vmatpush3.msra.mxu0 %v1871_v11 }
 0x45c   :  { %1722 = vmatprep.subr.mxu0 %v1785_v0 }
 0x45d   :  { %1723 = vmatpush3.msra.mxu0 %v1875_v12 }
 0x45e   :  { %1724 = vmatprep.subr.mxu0 %v1785_v0 }
 0x45f   :  { %1725 = vmatpush3.msra.mxu0 %v1879_v13 }
 0x460   :  { %1726 = vmatprep.subr.mxu0 %v1785_v0 }
 0x461   :  { %1727 = vmatpush3.msra.mxu0 %v1883_v14 }
 0x462   :  { %1728 = vmatprep.subr.mxu0 %v1785_v0 }
 0x463   :  { %1729 = vmatpush3.msra.mxu0 %v1887_v15 }
 0x464   :  { %1730 = vmatprep.subr.mxu0 %v1785_v0 }
 0x465   :  { %1731 = vmatpush3.msra.mxu0 %v1891_v16 }
 0x466   :  { %1732 = vmatprep.subr.mxu0 %v1785_v0 }
 0x467   :  { %1733 = vmatpush3.msra.mxu0 %v1895_v17 }
 0x468   :  { %1734 = vmatprep.subr.mxu0 %v1785_v0 }
 0x469   :  { %1735 = vmatpush3.msra.mxu0 %v1899_v18 }
 0x506   :  { %v941_v3 = vpop.f32.mrf.mxu0 }
 0x507   :  { %v945_v4 = vadd.f32 %v941_v3, %v872_v1 }
 0x508   :  { %v1658_v5 = vpop.f32.mrf.mxu0 }
 0x509   :  { %1754 = vtanh.f32 %v945_v4 }
 0x50a   :  { %v1165_v7 = vpop.f32.mrf.mxu0 }
 0x50b   :  { %v1166_v13 = vadd.f32 %v1991_v24, %v1165_v7 }
 0x50c   :  { %v1703_v8 = vpop.f32.mrf.mxu0 }
 0x516   :  { %v1755_v6 = vpop.eup %1754 }
 0x517   :  { %1697 = vmatmul.mubr.f32.vlgmr.msra.gmra.mxu1 %v1755_v6 }
 0x5d7   :  { %v1088_v10 = vpop.f32.mrf.mxu1 }
 0x5d8   :  { %v1092_v11 = vadd.f32 %v1088_v10, %v1019_v9 }
 0x5d9   :  { %v1698_v12 = vpop.f32.mrf.mxu1 }
 0x5da   :  { %1756 = vtanh.f32 %v1092_v11 }
 0x5e7   :  { %v1757_v0 = vpop.eup %1756 }
 0x5e8   :  { %1737 = vmatmul.mubr.f32.vlgmr.msra.gmra.mxu0 %v1757_v0 }
 0x6a8   :  { %v1235_v14 = vpop.f32.mrf.mxu0 }
 0x6a9   :  { %v1239_v15 = vadd.f32 %v1235_v14, %v1166_v13 }
 0x6aa   :  { %v1738_v16 = vpop.f32.mrf.mxu0 }
 0x6ab   :  { %1758 = vtanh.f32 %v1239_v15 }
 0x6b8   :  { %v1759_v17 = vpop.eup %1758 }
 0x6b9   :  { %1245 = vst [vmem:[%s2229_s5] sm:$0xff] %v1759_v17 }
 0x6ba   :  { %1250 = vsyncpa [#allocation4], 1 }

</bundles_post_ra>
